<compile_context>
chip_gen: v7x
topology: tpu7x:2x2x1
jax: 0.10.0
libtpu: 0.0.40
codegen_flags: <defaults>
</compile_context>

<pallas_src>
import functools
from typing import NamedTuple

import jax
import jax.numpy as jnp
from jax.experimental import pallas as pl
from jax.experimental.pallas import tpu as pltpu


# ----------------------------------------------------------------------------
# Packed-parameter layout: n_blocks stacked (width, width) fused weight blocks
# plus one (8, width) bias slab.  width is a multiple of 128 (lane-dense).
# ----------------------------------------------------------------------------
def _round_up(n, m):
    return (n + m - 1) // m * m


class Layout(NamedTuple):
    d_tfeat: int
    d_afeat: int
    d_vfeat: int
    d_tout: int
    d_aout: int
    d_vout: int
    d_prjh: int
    n_class: int
    width: int      # lane width of every activation / weight block (mult of 128)
    n_blocks: int


def make_layout(d_tfeat, d_afeat, d_vfeat, d_tout, d_aout, d_vout,
                d_prjh, n_class):
    D_in = d_tfeat + d_afeat + d_vfeat
    D_enc = d_tout + d_aout + d_vout
    D_mm = 2 * (d_aout + d_vout)
    width = _round_up(max(D_in, D_enc, D_mm + d_prjh, n_class), 128)
    # lld / nce live in lanes width-2 / width-1 of row 0 of the output slab
    assert n_class <= width - 2
    return Layout(d_tfeat, d_afeat, d_vfeat, d_tout, d_aout, d_vout,
                  d_prjh, n_class, width, 5)


def _block_diag(blocks):
    rows = sum(b.shape[0] for b in blocks)
    cols = sum(b.shape[1] for b in blocks)
    out = jnp.zeros((rows, cols), jnp.float32)
    r = c = 0
    for b in blocks:
        out = out.at[r:r + b.shape[0], c:c + b.shape[1]].set(b)
        r += b.shape[0]
        c += b.shape[1]
    return out


def pack_params(p, L: Layout):
    """Host-side one-time packing of all 36 weights/biases into two slabs."""
    Wd = L.width
    D_mm = 2 * (L.d_aout + L.d_vout)

    def blk(*placements):
        out = jnp.zeros((Wd, Wd), jnp.float32)
        for r0, c0, m in placements:
            out = out.at[r0:r0 + m.shape[0], c0:c0 + m.shape[1]].set(m)
        return out

    # MMILB first layers (all consume `text`), columns [mu_ta|mu_tv|lv_ta|lv_tv]
    W_mm1 = jnp.concatenate(
        [p["Wta_mu1"], p["Wtv_mu1"], p["Wta_lv1"], p["Wtv_lv1"]], axis=1)
    # MMILB second layers, block-diagonal in the same column order
    W_mm2 = _block_diag([p["Wta_mu2"], p["Wtv_mu2"], p["Wta_lv2"], p["Wtv_lv2"]])
    # CPC heads (all consume `fusion`), columns match enc layout [t|a|v]
    W_cpc = jnp.concatenate([p["Wct"], p["Wca"], p["Wcv"]], axis=1)

    W_slab = jnp.stack([
        # block 0: modality encoders, block-diagonal: x_cat -> enc = [t|a|v|0]
        blk((0, 0, p["Wt"]),
            (L.d_tfeat, L.d_tout, p["Wa"]),
            (L.d_tfeat + L.d_afeat, L.d_tout + L.d_aout, p["Wv"])),
        # block 1: [MMILB first layers (text rows) | SubNet f1 (all enc rows)]
        blk((0, 0, W_mm1), (0, D_mm, p["Wf1"])),
        # block 2: [MMILB second layers block-diag | SubNet f2]
        blk((0, 0, W_mm2), (D_mm, D_mm, p["Wf2"])),
        # block 3: CPC projections (consume fusion columns, zero rows elsewhere)
        blk((D_mm, 0, W_cpc)),
        # block 4: prediction head f3, output lane-padded to full width
        blk((D_mm, 0, p["Wf3"])),
    ])

    def brow(*placements):
        out = jnp.zeros((1, Wd), jnp.float32)
        for c0, m in placements:
            out = out.at[0:1, c0:c0 + m.shape[1]].set(m)
        return out

    b_slab = jnp.concatenate([
        brow((0, jnp.concatenate([p["bt"], p["ba"], p["bv"]], axis=1))),
        brow((0, jnp.concatenate([p["bta_mu1"], p["btv_mu1"],
                                  p["bta_lv1"], p["btv_lv1"]], axis=1)),
             (D_mm, p["bf1"])),
        brow((0, jnp.concatenate([p["bta_mu2"], p["btv_mu2"],
                                  p["bta_lv2"], p["btv_lv2"]], axis=1)),
             (D_mm, p["bf2"])),
        brow((0, jnp.concatenate([p["bct"], p["bca"], p["bcv"]], axis=1))),
        brow((0, p["bf3"])),
        jnp.zeros((3, Wd), jnp.float32),
    ], axis=0)                                   # (8, width)
    return W_slab, b_slab


# ----------------------------------------------------------------------------
# Kernel
# ----------------------------------------------------------------------------
def _mmim_kernel(t_ref, a_ref, v_ref, w_ref, b_ref, out_ref, *, layout):
    L = layout
    f32 = jnp.float32
    B = t_ref.shape[0]
    Wd = L.width
    D_in = L.d_tfeat + L.d_afeat + L.d_vfeat
    D_enc = L.d_tout + L.d_aout + L.d_vout
    D_mm = 2 * (L.d_aout + L.d_vout)
    half = L.d_aout + L.d_vout

    def mm(act, k):
        # (B, width) @ (width, width) block k, f32 MXU accumulation.
        return jnp.dot(act, w_ref[k], preferred_element_type=f32)

    def bias(i):
        return b_ref[i:i + 1, :]

    def relu(z):
        return jnp.maximum(z, 0.0)

    # --- lane-concatenate raw inputs [text | acoustic | visual | 0-pad] ------
    pieces = [t_ref[...].astype(f32), a_ref[...].astype(f32),
              v_ref[...].astype(f32)]
    if Wd > D_in:
        pieces.append(jnp.zeros((B, Wd - D_in), f32))
    x = jnp.concatenate(pieces, axis=1)                       # (B, width)

    # --- (1) modality encoders (block-diag): enc = [text | acoustic | visual | 0]
    enc = mm(x, 0) + bias(0)

    # --- (2) MMILB first layers + SubNet f1 fused: [mm1_pre | f1_pre | 0] -----
    combo1 = mm(enc, 1) + bias(1)

    # --- (3) MMILB second layers + SubNet f2 fused: [mu_ta|mu_tv|lv_ta|lv_tv | fusion | 0]
    combo2 = mm(relu(combo1), 2) + bias(2)

    # --- MMILB gaussian lld lower bound (y=None path), ta + tv together -------
    mus = combo2[:, 0:half]                      # [mu_ta | mu_tv]
    lvs = combo2[:, half:D_mm]                   # [lv_ta | lv_tv]
    av = enc[:, L.d_tout:D_enc]                  # [acoustic | visual]
    diff = mus - av
    positive = diff * diff * (-0.5) * jnp.exp(-lvs)           # no VPU divide
    lld = jnp.sum(jnp.sum(positive, axis=1, keepdims=True),
                  axis=0, keepdims=True) * (1.0 / B)          # lld_tv + lld_ta

    # --- (4) CPC projections xp = [xp_t | xp_a | xp_v | 0] --------------------
    # block 3 has non-zero rows only under the fusion columns of combo2
    xp = mm(combo2, 3) + bias(3)

    # --- (5) prediction head, output lane-padded to full width ----------------
    # block 4 has non-zero rows only under relu(fusion); cols >= n_class are 0
    preds_full = mm(relu(combo2), 4) + bias(4)                # (B, width)

    # --- CPC InfoNCE ----------------------------------------------------------
    def nce_term(xm, xpm):
        # rsqrt normalisation (EUP) — matches reference divide-by-norm exactly
        # (no eps, so an all-zero row would NaN just like the reference).
        xn = xm * jax.lax.rsqrt(jnp.sum(xm * xm, axis=-1, keepdims=True))
        xpn = xpm * jax.lax.rsqrt(jnp.sum(xpm * xpm, axis=-1, keepdims=True))
        pos = jnp.sum(xn * xpn, axis=-1, keepdims=True)       # diag, no (B,B) mask
        # NT dot_general: s[i, j] = <xn_i, xpn_j>, no transpose materialised
        s = jax.lax.dot_general(xn, xpn, (((1,), (1,)), ((), ())),
                                preferred_element_type=f32)
        m = jnp.max(s, axis=-1, keepdims=True)
        neg = jnp.log(jnp.sum(jnp.exp(s - m), axis=-1, keepdims=True)) + m
        return jnp.sum(neg - pos, axis=0, keepdims=True) * (1.0 / B)

    ot = L.d_tout
    oa = ot + L.d_aout
    nce = (nce_term(enc[:, 0:ot], xp[:, 0:ot])                 # text
           + nce_term(enc[:, oa:D_enc], xp[:, oa:D_enc])       # visual
           + nce_term(enc[:, ot:oa], xp[:, ot:oa]))            # acoustic

    # --- single lane-dense output slab ----------------------------------------
    # preds in lanes [0:n_class) of all rows; lld / nce in lanes width-2/width-1
    # of row 0 (those lanes are exact zeros in preds_full).
    row = jax.lax.broadcasted_iota(jnp.int32, (B, Wd), 0)
    lane = jax.lax.broadcasted_iota(jnp.int32, (B, Wd), 1)
    slab = jnp.where((row == 0) & (lane == Wd - 2), lld, preds_full)
    slab = jnp.where((row == 0) & (lane == Wd - 1), nce, slab)
    out_ref[...] = slab


# ----------------------------------------------------------------------------
# Wrapper
# ----------------------------------------------------------------------------
def mmim_forward(visual, acoustic, text, W_slab, b_slab, layout: Layout):
    """MMIM forward (y=None path) in one Pallas kernel.

    Returns (lld, nce, preds, pn_dic, H) mirroring the PyTorch module.
    """
    B = text.shape[0]
    vmem = pl.BlockSpec(memory_space=pltpu.MemorySpace.VMEM)
    out = pl.pallas_call(
        functools.partial(_mmim_kernel, layout=layout),
        out_shape=jax.ShapeDtypeStruct((B, layout.width), jnp.float32),
        in_specs=[vmem, vmem, vmem, vmem, vmem],
        out_specs=vmem,
    )(text, acoustic, visual, W_slab, b_slab)

    preds = out[:, 0:layout.n_class]
    lld = out[0, layout.width - 2]
    nce = out[0, layout.width - 1]

    pn_dic = {"tv": {"pos": None, "neg": None},
              "ta": {"pos": None, "neg": None},
              "va": None}                      # add_va = False
    H = 0.0
    return lld, nce, preds, pn_dic, H


# ----------------------------------------------------------------------------
# Pure-JAX reference (mirrors the PyTorch forward exactly) for verification
# ----------------------------------------------------------------------------
def mmim_reference(visual, acoustic, text, p):
    lin = lambda x, W, b: x @ W + b
    relu = lambda z: jnp.maximum(z, 0.0)

    v = lin(visual, p["Wv"], p["bv"])
    a = lin(acoustic, p["Wa"], p["ba"])
    t = lin(text, p["Wt"], p["bt"])

    def mmilb(x, ytgt, tag):
        mu = lin(relu(lin(x, p[f"W{tag}_mu1"], p[f"b{tag}_mu1"])),
                 p[f"W{tag}_mu2"], p[f"b{tag}_mu2"])
        lv = lin(relu(lin(x, p[f"W{tag}_lv1"], p[f"b{tag}_lv1"])),
                 p[f"W{tag}_lv2"], p[f"b{tag}_lv2"])
        positive = -((mu - ytgt) ** 2) / 2.0 / jnp.exp(lv)
        return jnp.mean(jnp.sum(positive, axis=-1))

    lld = mmilb(t, v, "tv") + mmilb(t, a, "ta")

    cat = jnp.concatenate([t, a, v], axis=1)
    y1 = relu(cat @ p["Wf1"] + p["bf1"])
    fusion = y1 @ p["Wf2"] + p["bf2"]
    preds = relu(fusion) @ p["Wf3"] + p["bf3"]

    def cpc(x, Wc, bc):
        xp = fusion @ Wc + bc
        xp = xp / jnp.linalg.norm(xp, axis=1, keepdims=True)
        xn = x / jnp.linalg.norm(x, axis=1, keepdims=True)
        pos = jnp.sum(xn * xp, axis=-1)
        neg = jax.scipy.special.logsumexp(xn @ xp.T, axis=-1)
        return -jnp.mean(pos - neg)

    nce = (cpc(t, p["Wct"], p["bct"])
           + cpc(v, p["Wcv"], p["bcv"])
           + cpc(a, p["Wca"], p["bca"]))
    return lld, nce, preds


# ----------------------------------------------------------------------------
# Deterministic parameter init (PyTorch nn.Linear default: U(-k, k), k=1/sqrt(fan_in))
# ----------------------------------------------------------------------------
def _linear_params(key, fan_in, fan_out):
    k = 1.0 / jnp.sqrt(jnp.float32(fan_in))
    kw, kb = jax.random.split(key)
    W = jax.random.uniform(kw, (fan_in, fan_out), jnp.float32, -k, k)  # [in, out]
    b = jax.random.uniform(kb, (1, fan_out), jnp.float32, -k, k)
    return W, b


def make_params(key, d_tfeat, d_afeat, d_vfeat,
                d_tout, d_aout, d_vout, d_prjh, n_class):
    keys = jax.random.split(key, 24)
    ki = iter(keys)
    p = {}

    p["Wt"], p["bt"] = _linear_params(next(ki), d_tfeat, d_tout)
    p["Wa"], p["ba"] = _linear_params(next(ki), d_afeat, d_aout)
    p["Wv"], p["bv"] = _linear_params(next(ki), d_vfeat, d_vout)

    # MMILB(text -> visual)
    p["Wtv_mu1"], p["btv_mu1"] = _linear_params(next(ki), d_tout, d_vout)
    p["Wtv_mu2"], p["btv_mu2"] = _linear_params(next(ki), d_vout, d_vout)
    p["Wtv_lv1"], p["btv_lv1"] = _linear_params(next(ki), d_tout, d_vout)
    p["Wtv_lv2"], p["btv_lv2"] = _linear_params(next(ki), d_vout, d_vout)
    # MMILB(text -> acoustic)
    p["Wta_mu1"], p["bta_mu1"] = _linear_params(next(ki), d_tout, d_aout)
    p["Wta_mu2"], p["bta_mu2"] = _linear_params(next(ki), d_aout, d_aout)
    p["Wta_lv1"], p["bta_lv1"] = _linear_params(next(ki), d_tout, d_aout)
    p["Wta_lv2"], p["bta_lv2"] = _linear_params(next(ki), d_aout, d_aout)

    # SubNet fusion: Linear(dim_sum, d_prjh) over cat([text, acoustic, visual])
    dim_sum = d_tout + d_aout + d_vout
    p["Wf1"], p["bf1"] = _linear_params(next(ki), dim_sum, d_prjh)
    p["Wf2"], p["bf2"] = _linear_params(next(ki), d_prjh, d_prjh)
    p["Wf3"], p["bf3"] = _linear_params(next(ki), d_prjh, n_class)

    # CPC heads (cpc_layers = 1 -> single Linear(d_prjh, x_size))
    p["Wct"], p["bct"] = _linear_params(next(ki), d_prjh, d_tout)
    p["Wcv"], p["bcv"] = _linear_params(next(ki), d_prjh, d_vout)
    p["Wca"], p["bca"] = _linear_params(next(ki), d_prjh, d_aout)
    return p


# ----------------------------------------------------------------------------
if __name__ == "__main__":
    # Small, forward-consistent hyperparameters.
    B = 8
    d_tfeat, d_afeat, d_vfeat = 32, 16, 16
    d_tout, d_aout, d_vout = 32, 16, 16
    d_prjh, n_class = 32, 1

    key = jax.random.PRNGKey(0)
    k_data, k_param = jax.random.split(key)
    kv, ka, kt = jax.random.split(k_data, 3)

    visual = jax.random.normal(kv, (B, d_vfeat), jnp.float32)
    acoustic = jax.random.normal(ka, (B, d_afeat), jnp.float32)
    text = jax.random.normal(kt, (B, d_tfeat), jnp.float32)

    params = make_params(k_param, d_tfeat, d_afeat, d_vfeat,
                         d_tout, d_aout, d_vout, d_prjh, n_class)
    layout = make_layout(d_tfeat, d_afeat, d_vfeat,
                         d_tout, d_aout, d_vout, d_prjh, n_class)

    # Host-side one-time packing: 2 parameter buffers (f32, lane-dense blocks).
    W_slab, b_slab = pack_params(params, layout)

    lld, nce, preds, pn_dic, H = mmim_forward(visual, acoustic, text,
                                              W_slab, b_slab, layout)
    jax.block_until_ready((lld, nce, preds))

    # Sanity check against a pure-JAX reference of the PyTorch forward.
    lld_r, nce_r, preds_r = mmim_reference(visual, acoustic, text, params)
    assert jnp.allclose(lld, lld_r, rtol=1e-2, atol=1e-2), (lld, lld_r)
    assert jnp.allclose(nce, nce_r, rtol=1e-2, atol=1e-2), (nce, nce_r)
    assert jnp.allclose(preds, preds_r, rtol=1e-2, atol=1e-2)
    assert H == 0.0 and pn_dic["va"] is None

    print("KERNEL_OK")
</pallas_src>

<mosaic_0001>
module attributes {stable_mosaic.version = 11 : i64} {
  func.func @_mmim_kernel(%arg0: memref<8x32xf32, #tpu.memory_space<vmem>>, %arg1: memref<8x16xf32, #tpu.memory_space<vmem>>, %arg2: memref<8x16xf32, #tpu.memory_space<vmem>>, %arg3: memref<5x128x128xf32, #tpu.memory_space<vmem>>, %arg4: memref<8x128xf32, #tpu.memory_space<vmem>>, %arg5: memref<8x128xf32, #tpu.memory_space<vmem>>) attributes {dimension_semantics = [], scalar_prefetch = 0 : i64, scratch_operands = 0 : i64, tpu.core_type = #tpu.core_type<tc>} {
    %c0 = arith.constant 0 : index
    %c0_0 = arith.constant 0 : index
    %0 = vector.load %arg0[%c0, %c0_0] : memref<8x32xf32, #tpu.memory_space<vmem>>, vector<8x32xf32>
    %c0_1 = arith.constant 0 : index
    %c0_2 = arith.constant 0 : index
    %1 = vector.load %arg1[%c0_1, %c0_2] : memref<8x16xf32, #tpu.memory_space<vmem>>, vector<8x16xf32>
    %c0_3 = arith.constant 0 : index
    %c0_4 = arith.constant 0 : index
    %2 = vector.load %arg2[%c0_3, %c0_4] : memref<8x16xf32, #tpu.memory_space<vmem>>, vector<8x16xf32>
    %cst = arith.constant 0.000000e+00 : f32
    %3 = vector.broadcast %cst : f32 to vector<8x64xf32>
    %4 = tpu.concatenate %0, %1, %2, %3 in 1 : vector<8x32xf32>, vector<8x16xf32>, vector<8x16xf32>, vector<8x64xf32> -> vector<8x128xf32>
    %c0_5 = arith.constant 0 : index
    %c0_6 = arith.constant 0 : index
    %c0_7 = arith.constant 0 : index
    %5 = vector.load %arg3[%c0_5, %c0_6, %c0_7] : memref<5x128x128xf32, #tpu.memory_space<vmem>>, vector<1x128x128xf32>
    %6 = vector.shape_cast %5 : vector<1x128x128xf32> to vector<128x128xf32>
    %cst_8 = arith.constant dense<0.000000e+00> : vector<8x128xf32>
    %7 = tpu.matmul %4, %6, %cst_8 {dimension_numbers = #tpu.dot_dimension_numbers<[1], [0], [0], [1], [0, 0, 1, 1], [], []>} : vector<8x128xf32>, vector<128x128xf32>, vector<8x128xf32> -> vector<8x128xf32>
    %c0_9 = arith.constant 0 : index
    %c0_10 = arith.constant 0 : index
    %8 = vector.load %arg4[%c0_9, %c0_10] : memref<8x128xf32, #tpu.memory_space<vmem>>, vector<1x128xf32>
    %9 = vector.broadcast %8 : vector<1x128xf32> to vector<8x128xf32>
    %10 = arith.addf %7, %9 : vector<8x128xf32>
    %c1 = arith.constant 1 : index
    %c0_11 = arith.constant 0 : index
    %c0_12 = arith.constant 0 : index
    %11 = vector.load %arg3[%c1, %c0_11, %c0_12] : memref<5x128x128xf32, #tpu.memory_space<vmem>>, vector<1x128x128xf32>
    %12 = vector.shape_cast %11 : vector<1x128x128xf32> to vector<128x128xf32>
    %cst_13 = arith.constant dense<0.000000e+00> : vector<8x128xf32>
    %13 = tpu.matmul %10, %12, %cst_13 {dimension_numbers = #tpu.dot_dimension_numbers<[1], [0], [0], [1], [0, 0, 1, 1], [], []>} : vector<8x128xf32>, vector<128x128xf32>, vector<8x128xf32> -> vector<8x128xf32>
    %c1_14 = arith.constant 1 : index
    %c0_15 = arith.constant 0 : index
    %14 = vector.load %arg4[%c1_14, %c0_15] : memref<8x128xf32, #tpu.memory_space<vmem>>, vector<1x128xf32>
    %15 = vector.broadcast %14 : vector<1x128xf32> to vector<8x128xf32>
    %16 = arith.addf %13, %15 : vector<8x128xf32>
    %cst_16 = arith.constant 0.000000e+00 : f32
    %17 = vector.broadcast %cst_16 : f32 to vector<8x128xf32>
    %18 = arith.maximumf %16, %17 : vector<8x128xf32>
    %c2 = arith.constant 2 : index
    %c0_17 = arith.constant 0 : index
    %c0_18 = arith.constant 0 : index
    %19 = vector.load %arg3[%c2, %c0_17, %c0_18] : memref<5x128x128xf32, #tpu.memory_space<vmem>>, vector<1x128x128xf32>
    %20 = vector.shape_cast %19 : vector<1x128x128xf32> to vector<128x128xf32>
    %cst_19 = arith.constant dense<0.000000e+00> : vector<8x128xf32>
    %21 = tpu.matmul %18, %20, %cst_19 {dimension_numbers = #tpu.dot_dimension_numbers<[1], [0], [0], [1], [0, 0, 1, 1], [], []>} : vector<8x128xf32>, vector<128x128xf32>, vector<8x128xf32> -> vector<8x128xf32>
    %c2_20 = arith.constant 2 : index
    %c0_21 = arith.constant 0 : index
    %22 = vector.load %arg4[%c2_20, %c0_21] : memref<8x128xf32, #tpu.memory_space<vmem>>, vector<1x128xf32>
    %23 = vector.broadcast %22 : vector<1x128xf32> to vector<8x128xf32>
    %24 = arith.addf %21, %23 : vector<8x128xf32>
    %25 = vector.extract_strided_slice %24 {offsets = [0, 0], sizes = [8, 32], strides = [1, 1]} : vector<8x128xf32> to vector<8x32xf32>
    %26 = vector.extract_strided_slice %24 {offsets = [0, 32], sizes = [8, 32], strides = [1, 1]} : vector<8x128xf32> to vector<8x32xf32>
    %27 = vector.extract_strided_slice %10 {offsets = [0, 32], sizes = [8, 32], strides = [1, 1]} : vector<8x128xf32> to vector<8x32xf32>
    %28 = arith.subf %25, %27 : vector<8x32xf32>
    %29 = arith.mulf %28, %28 : vector<8x32xf32>
    %cst_22 = arith.constant -5.000000e-01 : f32
    %30 = vector.broadcast %cst_22 : f32 to vector<8x32xf32>
    %31 = arith.mulf %29, %30 : vector<8x32xf32>
    %cst_23 = arith.constant 0.000000e+00 : f32
    %32 = vector.broadcast %cst_23 : f32 to vector<8x32xf32>
    %33 = arith.subf %32, %26 : vector<8x32xf32>
    %34 = math.exp %33 : vector<8x32xf32>
    %35 = arith.mulf %31, %34 : vector<8x32xf32>
    %cst_24 = arith.constant dense<0.000000e+00> : vector<8xf32>
    %36 = vector.multi_reduction <add>, %35, %cst_24 [1] : vector<8x32xf32> to vector<8xf32>
    %37 = vector.shape_cast %36 : vector<8xf32> to vector<8x1xf32>
    %cst_25 = arith.constant dense<0.000000e+00> : vector<1xf32>
    %38 = vector.multi_reduction <add>, %37, %cst_25 [0] : vector<8x1xf32> to vector<1xf32>
    %39 = vector.shape_cast %38 : vector<1xf32> to vector<1x1xf32>
    %cst_26 = arith.constant 1.250000e-01 : f32
    %40 = vector.broadcast %cst_26 : f32 to vector<1x1xf32>
    %41 = arith.mulf %39, %40 : vector<1x1xf32>
    %c3 = arith.constant 3 : index
    %c0_27 = arith.constant 0 : index
    %c0_28 = arith.constant 0 : index
    %42 = vector.load %arg3[%c3, %c0_27, %c0_28] : memref<5x128x128xf32, #tpu.memory_space<vmem>>, vector<1x128x128xf32>
    %43 = vector.shape_cast %42 : vector<1x128x128xf32> to vector<128x128xf32>
    %cst_29 = arith.constant dense<0.000000e+00> : vector<8x128xf32>
    %44 = tpu.matmul %24, %43, %cst_29 {dimension_numbers = #tpu.dot_dimension_numbers<[1], [0], [0], [1], [0, 0, 1, 1], [], []>} : vector<8x128xf32>, vector<128x128xf32>, vector<8x128xf32> -> vector<8x128xf32>
    %c3_30 = arith.constant 3 : index
    %c0_31 = arith.constant 0 : index
    %45 = vector.load %arg4[%c3_30, %c0_31] : memref<8x128xf32, #tpu.memory_space<vmem>>, vector<1x128xf32>
    %46 = vector.broadcast %45 : vector<1x128xf32> to vector<8x128xf32>
    %47 = arith.addf %44, %46 : vector<8x128xf32>
    %cst_32 = arith.constant 0.000000e+00 : f32
    %48 = vector.broadcast %cst_32 : f32 to vector<8x128xf32>
    %49 = arith.maximumf %24, %48 : vector<8x128xf32>
    %c4 = arith.constant 4 : index
    %c0_33 = arith.constant 0 : index
    %c0_34 = arith.constant 0 : index
    %50 = vector.load %arg3[%c4, %c0_33, %c0_34] : memref<5x128x128xf32, #tpu.memory_space<vmem>>, vector<1x128x128xf32>
    %51 = vector.shape_cast %50 : vector<1x128x128xf32> to vector<128x128xf32>
    %cst_35 = arith.constant dense<0.000000e+00> : vector<8x128xf32>
    %52 = tpu.matmul %49, %51, %cst_35 {dimension_numbers = #tpu.dot_dimension_numbers<[1], [0], [0], [1], [0, 0, 1, 1], [], []>} : vector<8x128xf32>, vector<128x128xf32>, vector<8x128xf32> -> vector<8x128xf32>
    %c4_36 = arith.constant 4 : index
    %c0_37 = arith.constant 0 : index
    %53 = vector.load %arg4[%c4_36, %c0_37] : memref<8x128xf32, #tpu.memory_space<vmem>>, vector<1x128xf32>
    %54 = vector.broadcast %53 : vector<1x128xf32> to vector<8x128xf32>
    %55 = arith.addf %52, %54 : vector<8x128xf32>
    %56 = vector.extract_strided_slice %10 {offsets = [0, 0], sizes = [8, 32], strides = [1, 1]} : vector<8x128xf32> to vector<8x32xf32>
    %57 = vector.extract_strided_slice %47 {offsets = [0, 0], sizes = [8, 32], strides = [1, 1]} : vector<8x128xf32> to vector<8x32xf32>
    %58 = arith.mulf %56, %56 : vector<8x32xf32>
    %cst_38 = arith.constant dense<0.000000e+00> : vector<8xf32>
    %59 = vector.multi_reduction <add>, %58, %cst_38 [1] : vector<8x32xf32> to vector<8xf32>
    %60 = vector.shape_cast %59 : vector<8xf32> to vector<8x1xf32>
    %61 = math.rsqrt %60 : vector<8x1xf32>
    %62 = vector.broadcast %61 : vector<8x1xf32> to vector<8x32xf32>
    %63 = arith.mulf %56, %62 : vector<8x32xf32>
    %64 = arith.mulf %57, %57 : vector<8x32xf32>
    %cst_39 = arith.constant dense<0.000000e+00> : vector<8xf32>
    %65 = vector.multi_reduction <add>, %64, %cst_39 [1] : vector<8x32xf32> to vector<8xf32>
    %66 = vector.shape_cast %65 : vector<8xf32> to vector<8x1xf32>
    %67 = math.rsqrt %66 : vector<8x1xf32>
    %68 = vector.broadcast %67 : vector<8x1xf32> to vector<8x32xf32>
    %69 = arith.mulf %57, %68 : vector<8x32xf32>
    %70 = arith.mulf %63, %69 : vector<8x32xf32>
    %cst_40 = arith.constant dense<0.000000e+00> : vector<8xf32>
    %71 = vector.multi_reduction <add>, %70, %cst_40 [1] : vector<8x32xf32> to vector<8xf32>
    %72 = vector.shape_cast %71 : vector<8xf32> to vector<8x1xf32>
    %cst_41 = arith.constant dense<0.000000e+00> : vector<8x8xf32>
    %73 = tpu.matmul %63, %69, %cst_41 {dimension_numbers = #tpu.dot_dimension_numbers<[1], [1], [0], [0], [0, 0, 1, 0], [], []>} : vector<8x32xf32>, vector<8x32xf32>, vector<8x8xf32> -> vector<8x8xf32>
    %cst_42 = arith.constant dense<0xFF800000> : vector<8xf32>
    %74 = vector.multi_reduction <maximumf>, %73, %cst_42 [1] : vector<8x8xf32> to vector<8xf32>
    %75 = vector.shape_cast %74 : vector<8xf32> to vector<8x1xf32>
    %76 = vector.broadcast %75 : vector<8x1xf32> to vector<8x8xf32>
    %77 = arith.subf %73, %76 : vector<8x8xf32>
    %78 = math.exp %77 : vector<8x8xf32>
    %cst_43 = arith.constant dense<0.000000e+00> : vector<8xf32>
    %79 = vector.multi_reduction <add>, %78, %cst_43 [1] : vector<8x8xf32> to vector<8xf32>
    %80 = vector.shape_cast %79 : vector<8xf32> to vector<8x1xf32>
    %81 = math.log %80 : vector<8x1xf32>
    %82 = arith.addf %81, %75 : vector<8x1xf32>
    %83 = arith.subf %82, %72 : vector<8x1xf32>
    %cst_44 = arith.constant dense<0.000000e+00> : vector<1xf32>
    %84 = vector.multi_reduction <add>, %83, %cst_44 [0] : vector<8x1xf32> to vector<1xf32>
    %85 = vector.shape_cast %84 : vector<1xf32> to vector<1x1xf32>
    %cst_45 = arith.constant 1.250000e-01 : f32
    %86 = vector.broadcast %cst_45 : f32 to vector<1x1xf32>
    %87 = arith.mulf %85, %86 : vector<1x1xf32>
    %88 = vector.extract_strided_slice %10 {offsets = [0, 48], sizes = [8, 16], strides = [1, 1]} : vector<8x128xf32> to vector<8x16xf32>
    %89 = vector.extract_strided_slice %47 {offsets = [0, 48], sizes = [8, 16], strides = [1, 1]} : vector<8x128xf32> to vector<8x16xf32>
    %90 = arith.mulf %88, %88 : vector<8x16xf32>
    %cst_46 = arith.constant dense<0.000000e+00> : vector<8xf32>
    %91 = vector.multi_reduction <add>, %90, %cst_46 [1] : vector<8x16xf32> to vector<8xf32>
    %92 = vector.shape_cast %91 : vector<8xf32> to vector<8x1xf32>
    %93 = math.rsqrt %92 : vector<8x1xf32>
    %94 = vector.broadcast %93 : vector<8x1xf32> to vector<8x16xf32>
    %95 = arith.mulf %88, %94 : vector<8x16xf32>
    %96 = arith.mulf %89, %89 : vector<8x16xf32>
    %cst_47 = arith.constant dense<0.000000e+00> : vector<8xf32>
    %97 = vector.multi_reduction <add>, %96, %cst_47 [1] : vector<8x16xf32> to vector<8xf32>
    %98 = vector.shape_cast %97 : vector<8xf32> to vector<8x1xf32>
    %99 = math.rsqrt %98 : vector<8x1xf32>
    %100 = vector.broadcast %99 : vector<8x1xf32> to vector<8x16xf32>
    %101 = arith.mulf %89, %100 : vector<8x16xf32>
    %102 = arith.mulf %95, %101 : vector<8x16xf32>
    %cst_48 = arith.constant dense<0.000000e+00> : vector<8xf32>
    %103 = vector.multi_reduction <add>, %102, %cst_48 [1] : vector<8x16xf32> to vector<8xf32>
    %104 = vector.shape_cast %103 : vector<8xf32> to vector<8x1xf32>
    %cst_49 = arith.constant dense<0.000000e+00> : vector<8x8xf32>
    %105 = tpu.matmul %95, %101, %cst_49 {dimension_numbers = #tpu.dot_dimension_numbers<[1], [1], [0], [0], [0, 0, 1, 0], [], []>} : vector<8x16xf32>, vector<8x16xf32>, vector<8x8xf32> -> vector<8x8xf32>
    %cst_50 = arith.constant dense<0xFF800000> : vector<8xf32>
    %106 = vector.multi_reduction <maximumf>, %105, %cst_50 [1] : vector<8x8xf32> to vector<8xf32>
    %107 = vector.shape_cast %106 : vector<8xf32> to vector<8x1xf32>
    %108 = vector.broadcast %107 : vector<8x1xf32> to vector<8x8xf32>
    %109 = arith.subf %105, %108 : vector<8x8xf32>
    %110 = math.exp %109 : vector<8x8xf32>
    %cst_51 = arith.constant dense<0.000000e+00> : vector<8xf32>
    %111 = vector.multi_reduction <add>, %110, %cst_51 [1] : vector<8x8xf32> to vector<8xf32>
    %112 = vector.shape_cast %111 : vector<8xf32> to vector<8x1xf32>
    %113 = math.log %112 : vector<8x1xf32>
    %114 = arith.addf %113, %107 : vector<8x1xf32>
    %115 = arith.subf %114, %104 : vector<8x1xf32>
    %cst_52 = arith.constant dense<0.000000e+00> : vector<1xf32>
    %116 = vector.multi_reduction <add>, %115, %cst_52 [0] : vector<8x1xf32> to vector<1xf32>
    %117 = vector.shape_cast %116 : vector<1xf32> to vector<1x1xf32>
    %cst_53 = arith.constant 1.250000e-01 : f32
    %118 = vector.broadcast %cst_53 : f32 to vector<1x1xf32>
    %119 = arith.mulf %117, %118 : vector<1x1xf32>
    %120 = arith.addf %87, %119 : vector<1x1xf32>
    %121 = vector.extract_strided_slice %10 {offsets = [0, 32], sizes = [8, 16], strides = [1, 1]} : vector<8x128xf32> to vector<8x16xf32>
    %122 = vector.extract_strided_slice %47 {offsets = [0, 32], sizes = [8, 16], strides = [1, 1]} : vector<8x128xf32> to vector<8x16xf32>
    %123 = arith.mulf %121, %121 : vector<8x16xf32>
    %cst_54 = arith.constant dense<0.000000e+00> : vector<8xf32>
    %124 = vector.multi_reduction <add>, %123, %cst_54 [1] : vector<8x16xf32> to vector<8xf32>
    %125 = vector.shape_cast %124 : vector<8xf32> to vector<8x1xf32>
    %126 = math.rsqrt %125 : vector<8x1xf32>
    %127 = vector.broadcast %126 : vector<8x1xf32> to vector<8x16xf32>
    %128 = arith.mulf %121, %127 : vector<8x16xf32>
    %129 = arith.mulf %122, %122 : vector<8x16xf32>
    %cst_55 = arith.constant dense<0.000000e+00> : vector<8xf32>
    %130 = vector.multi_reduction <add>, %129, %cst_55 [1] : vector<8x16xf32> to vector<8xf32>
    %131 = vector.shape_cast %130 : vector<8xf32> to vector<8x1xf32>
    %132 = math.rsqrt %131 : vector<8x1xf32>
    %133 = vector.broadcast %132 : vector<8x1xf32> to vector<8x16xf32>
    %134 = arith.mulf %122, %133 : vector<8x16xf32>
    %135 = arith.mulf %128, %134 : vector<8x16xf32>
    %cst_56 = arith.constant dense<0.000000e+00> : vector<8xf32>
    %136 = vector.multi_reduction <add>, %135, %cst_56 [1] : vector<8x16xf32> to vector<8xf32>
    %137 = vector.shape_cast %136 : vector<8xf32> to vector<8x1xf32>
    %cst_57 = arith.constant dense<0.000000e+00> : vector<8x8xf32>
    %138 = tpu.matmul %128, %134, %cst_57 {dimension_numbers = #tpu.dot_dimension_numbers<[1], [1], [0], [0], [0, 0, 1, 0], [], []>} : vector<8x16xf32>, vector<8x16xf32>, vector<8x8xf32> -> vector<8x8xf32>
    %cst_58 = arith.constant dense<0xFF800000> : vector<8xf32>
    %139 = vector.multi_reduction <maximumf>, %138, %cst_58 [1] : vector<8x8xf32> to vector<8xf32>
    %140 = vector.shape_cast %139 : vector<8xf32> to vector<8x1xf32>
    %141 = vector.broadcast %140 : vector<8x1xf32> to vector<8x8xf32>
    %142 = arith.subf %138, %141 : vector<8x8xf32>
    %143 = math.exp %142 : vector<8x8xf32>
    %cst_59 = arith.constant dense<0.000000e+00> : vector<8xf32>
    %144 = vector.multi_reduction <add>, %143, %cst_59 [1] : vector<8x8xf32> to vector<8xf32>
    %145 = vector.shape_cast %144 : vector<8xf32> to vector<8x1xf32>
    %146 = math.log %145 : vector<8x1xf32>
    %147 = arith.addf %146, %140 : vector<8x1xf32>
    %148 = arith.subf %147, %137 : vector<8x1xf32>
    %cst_60 = arith.constant dense<0.000000e+00> : vector<1xf32>
    %149 = vector.multi_reduction <add>, %148, %cst_60 [0] : vector<8x1xf32> to vector<1xf32>
    %150 = vector.shape_cast %149 : vector<1xf32> to vector<1x1xf32>
    %cst_61 = arith.constant 1.250000e-01 : f32
    %151 = vector.broadcast %cst_61 : f32 to vector<1x1xf32>
    %152 = arith.mulf %150, %151 : vector<1x1xf32>
    %153 = arith.addf %120, %152 : vector<1x1xf32>
    %154 = tpu.iota {dimensions = array<i32: 0>} : vector<8x128xi32>
    %155 = tpu.iota {dimensions = array<i32: 1>} : vector<8x128xi32>
    %c0_i32 = arith.constant 0 : i32
    %156 = vector.broadcast %c0_i32 : i32 to vector<8x128xi32>
    %157 = arith.cmpi eq, %154, %156 : vector<8x128xi32>
    %c126_i32 = arith.constant 126 : i32
    %158 = vector.broadcast %c126_i32 : i32 to vector<8x128xi32>
    %159 = arith.cmpi eq, %155, %158 : vector<8x128xi32>
    %160 = arith.andi %157, %159 : vector<8x128xi1>
    %161 = vector.shape_cast %41 : vector<1x1xf32> to vector<1x1xf32>
    %162 = vector.broadcast %161 : vector<1x1xf32> to vector<8x128xf32>
    %163 = arith.select %160, %162, %55 : vector<8x128xi1>, vector<8x128xf32>
    %c0_i32_62 = arith.constant 0 : i32
    %164 = vector.broadcast %c0_i32_62 : i32 to vector<8x128xi32>
    %165 = arith.cmpi eq, %154, %164 : vector<8x128xi32>
    %c127_i32 = arith.constant 127 : i32
    %166 = vector.broadcast %c127_i32 : i32 to vector<8x128xi32>
    %167 = arith.cmpi eq, %155, %166 : vector<8x128xi32>
    %168 = arith.andi %165, %167 : vector<8x128xi1>
    %169 = vector.shape_cast %153 : vector<1x1xf32> to vector<1x1xf32>
    %170 = vector.broadcast %169 : vector<1x1xf32> to vector<8x128xf32>
    %171 = arith.select %168, %170, %163 : vector<8x128xi1>, vector<8x128xf32>
    %c0_63 = arith.constant 0 : index
    %c0_64 = arith.constant 0 : index
    %172 = vector.load %arg5[%c0_63, %c0_64] : memref<8x128xf32, #tpu.memory_space<vmem>>, vector<8x128xf32>
    tpu.vector_store %arg5[%c0_63, %c0_64], %171 {strides = array<i32>} : memref<8x128xf32, #tpu.memory_space<vmem>>, vector<8x128xf32>,
    return
  }
}

</mosaic_0001>

<bundles_post_ra>
// kernel: tpu_custom_call.1
= control target key start
LH: loop header
LB: loop body
LE: loop exit
PB: predicated region body
PF: predicated region fallthrough
CT: control target
= control target key end

     0   :  { %10 = vsyncpa [#allocation3], 0  ;;  %s1777_s0 = inlined_call_operand.hbm [shape: f32[8,32], index: 0, kind: input, shape index: {}]   ;;  %s1778_s1 = inlined_call_operand.hbm [shape: f32[8,16], index: 1, kind: input, shape index: {}]   ;;  %s1779_s2 = inlined_call_operand.hbm [shape: f32[8,16], index: 2, kind: input, shape index: {}]   ;;  %s1780_s3 = inlined_call_operand.hbm [shape: f32[5,128,128], index: 3, kind: input, shape index: {}]   ;;  %s1781_s4 = inlined_call_operand.vmem [shape: f32[8,128], index: 4, kind: input, shape index: {}]   ;;  %s1782_s5 = inlined_call_operand.hbm [shape: f32[8,128], index: 5, kind: output, shape index: {}]  }
   0x1   :  { %11 = vsyncpa [#allocation6], 0 }
   0x2   :  { %12 = vsyncpa [#allocation9], 0 }
   0x3   :  { %13 = vsyncpa [#allocation4], 0  ;;  %s1539_s18 = smov [#allocation5]   ;;  %s1540_s20 = smov [#allocation2]  }
   0x4   :  { %s30_s19 = sshll.u32 %s1539_s18, 4  ;;  %s20_s21 = sshll.u32 %s1540_s20, 4  ;;  %s31_s19 = int_to_ptr.vmem [resolvable:$true] %s30_s19  ;;  %s21_s21 = int_to_ptr.vmem [resolvable:$true] %s20_s21 }
   0x5   :  { %s1421_s24 = scalar_lea.hbm %s1778_s1, 128 }
   0x6   :  { %p1422_p0 = scmp.ne.s32.totalorder %s1778_s1, %s1421_s24  ;;  %p1425_p1 = scmp.lt.u32.totalorder %s1421_s24, %s1778_s1 }
   0x8   :  { %p1427_p2 = pnand %p1425_p1, %p1422_p0 }
   0xa   :  { %1430 = shalt.err (!%p1427_p2)
}
   0xb   :  { %s1431_s29 = scalar_lea.vmem %s31_s19, 128  ;;  %p1436_p4 = scmp.lt.s32.totalorder %s31_s19, %s31_s19 }
   0xc   :  { %p1432_p3 = scmp.ne.s32.totalorder %s31_s19, %s1431_s29  ;;  %p1437_p5 = scmp.lt.s32.totalorder %s1431_s29, %s1431_s29 }
   0xe   :  { %p1438_p6 = por %p1437_p5, %p1436_p4 }
  0x10   :  { %p1439_p7 = pnand %p1438_p6, %p1432_p3 }
  0x12   :  { %1442 = shalt.err (!%p1439_p7)
}
  0x13   :  { %33 = dma.hbm_to_vmem [thread:$0]  %s1778_s1, 128, %s31_s19, [#allocation6]  }
  0x14   :  { %s1443_s9 = scalar_lea.hbm %s1777_s0, 128 }
  0x15   :  { %p1444_p8 = scmp.ne.s32.totalorder %s1777_s0, %s1443_s9  ;;  %p1447_p9 = scmp.lt.u32.totalorder %s1443_s9, %s1777_s0 }
  0x17   :  { %p1449_p10 = pnand %p1447_p9, %p1444_p8 }
  0x19   :  { %1452 = shalt.err (!%p1449_p10)
}
  0x1a   :  { %s1453_s14 = scalar_lea.vmem %s21_s21, 128  ;;  %p1458_p12 = scmp.lt.s32.totalorder %s21_s21, %s21_s21 }
  0x1b   :  { %p1454_p11 = scmp.ne.s32.totalorder %s21_s21, %s1453_s14  ;;  %p1459_p13 = scmp.lt.s32.totalorder %s1453_s14, %s1453_s14 }
  0x1d   :  { %p1460_p0 = por %p1459_p13, %p1458_p12 }
  0x1f   :  { %p1461_p1 = pnand %p1460_p0, %p1454_p11 }
  0x21   :  { %1464 = shalt.err (!%p1461_p1)
}
  0x22   :  { %23 = dma.hbm_to_vmem [thread:$0]  %s1777_s0, 128, %s21_s21, [#allocation3]  }
  0x23   :  { %s1541_s16 = smov [#allocation7]   ;;  %s1542_s18 = smov [#allocation8]  }
  0x24   :  { %s40_s17 = sshll.u32 %s1541_s16, 4  ;;  %s49_s19 = sshll.u32 %s1542_s18, 4  ;;  %s41_s17 = int_to_ptr.vmem [resolvable:$true] %s40_s17  ;;  %s1607_s19 = int_to_ptr.vmem [resolvable:$true] %s49_s19 }
  0x25   :  { %s1465_s23 = scalar_lea.hbm %s1779_s2, 128 }
  0x26   :  { %p1466_p2 = scmp.ne.s32.totalorder %s1779_s2, %s1465_s23  ;;  %p1469_p3 = scmp.lt.u32.totalorder %s1465_s23, %s1779_s2 }
  0x28   :  { %p1471_p4 = pnand %p1469_p3, %p1466_p2 }
  0x2a   :  { %1474 = shalt.err (!%p1471_p4)
}
  0x2b   :  { %s1475_s0 = scalar_lea.vmem %s41_s17, 128  ;;  %p1480_p6 = scmp.lt.s32.totalorder %s41_s17, %s41_s17 }
  0x2c   :  { %p1476_p5 = scmp.ne.s32.totalorder %s41_s17, %s1475_s0  ;;  %p1481_p7 = scmp.lt.s32.totalorder %s1475_s0, %s1475_s0 }
  0x2e   :  { %p1482_p8 = por %p1481_p7, %p1480_p6 }
  0x30   :  { %p1483_p9 = pnand %p1482_p8, %p1476_p5 }
  0x32   :  { %1486 = shalt.err (!%p1483_p9)
}
  0x33   :  { %43 = dma.hbm_to_vmem [thread:$0]  %s1779_s2, 128, %s41_s17, [#allocation6]  }
  0x34   :  { %s1487_s6 = scalar_lea.hbm %s1780_s3, 10240 }
  0x35   :  { %p1488_p10 = scmp.ne.s32.totalorder %s1780_s3, %s1487_s6  ;;  %p1491_p11 = scmp.lt.u32.totalorder %s1487_s6, %s1780_s3 }
  0x37   :  { %p1493_p12 = pnand %p1491_p11, %p1488_p10 }
  0x39   :  { %1496 = shalt.err (!%p1493_p12)
}
  0x3a   :  { %s1497_s11 = scalar_lea.vmem %s1607_s19, 10240  ;;  %p1502_p0 = scmp.lt.s32.totalorder %s1607_s19, %s1607_s19 }
  0x3b   :  { %p1498_p13 = scmp.ne.s32.totalorder %s1607_s19, %s1497_s11  ;;  %p1503_p1 = scmp.lt.s32.totalorder %s1497_s11, %s1497_s11 }
  0x3d   :  { %p1504_p2 = por %p1503_p1, %p1502_p0 }
  0x3f   :  { %p1505_p3 = pnand %p1504_p2, %p1498_p13 }
  0x41   :  { %1508 = shalt.err (!%p1505_p3)
}
  0x42   :  { %s1543_s2 = smov 128   ;;  %s1544_s12 = smov 8  }
  0x43   :  { %55 = dma.hbm_to_vmem [thread:$0]  %s1780_s3, 10240, %s1607_s19, [#allocation9], %s1543_s2, %s1543_s2, %s1544_s12  }
  0x44   :  { %1531 = dma.done.wait [#allocation3], 128  }
  0x45   :  { %1532 = vsyncadd [#allocation3], 4294967168 }
  0x46   :  { %1533 = dma.done.wait [#allocation6], 256  }
  0x47   :  { %1534 = vsyncadd [#allocation6], 4294967040 }
  0x48   :  { %1535 = dma.done.wait [#allocation9], 10240  }
  0x49   :  { %1536 = vsyncadd [#allocation9], 4294957056  ;;  %v1545_v0 = vmov 0.0|0.0   ;;  %vm1546_vm0 = vmmov 0   ;;  %v1547_v1 = vmov 0.0   ;;  %v71_v2 = vld [vmem:[#allocation5] sm:$0xff] }
  0x4a   :  { %1261 = vmatprep.subr.bf16.mxu0 %v1545_v0  ;;  %1285 = vmatprep.subr.bf16.mxu1 %v1545_v0  ;;  %v87_v3 = vld [vmem:[#allocation8] sm:$0xff]  ;;  %s1548_s3 = smov 32   ;;  %v88_v4 = vld [vmem:[#allocation8 + $0x8] sm:$0xff]  ;;  %v89_v5 = vld [vmem:[#allocation8 + $0x10] sm:$0xff]  ;;  %s1549_s1 = smov 48   ;;  %vm81_vm1 = vcmask 261120  }
  0x4b   :  { %1103 = vmatprep.mubr.msk.f32.mxu0 %vm1546_vm0, %v1547_v1  ;;  %1138 = vmatprep.mubr.msk.f32.mxu1 %vm1546_vm0, %v1547_v1  ;;  %v90_v6 = vld [vmem:[#allocation8 + $0x18] sm:$0xff]  ;;  %v1262_v8 = vpack.c.bf16 %v88_v4, %v87_v3  ;;  %v91_v10 = vld [vmem:[#allocation8 + $0x20] sm:$0xff]  ;;  %v92_v11 = vld [vmem:[#allocation8 + $0x28] sm:$0xff]  ;;  %vm83_vm2 = vcmask 392192   ;;  %vm85_vm3 = vcmask 523264   ;;  %s1550_s24 = smov 96  }
  0x4c   :  { %74 = vrot.lane.b32.xlu0 %v71_v2, %s1548_s3  ;;  %v72_v7 = vld [vmem:[#allocation7] sm:$0xff]  ;;  %v1265_v9 = vpack.c.bf16 %v90_v6, %v89_v5  ;;  %v179_v12 = vld [vmem:[#allocation8 + $0x80] sm:$0xff]  ;;  %v180_v13 = vld [vmem:[#allocation8 + $0x88] sm:$0xff]  ;;  %v1268_v17 = vpack.c.bf16 %v92_v11, %v91_v10  ;;  %s1551_s25 = smov 80   ;;  %vm690_vm4 = vcmask 130048   ;;  %vm665_vm5 = vcmask 64512  }
  0x4d   :  { %1263 = vmatpush3.bf16.msra.mxu0 %v1262_v8  ;;  %v1286_v14 = vpack.c.bf16 %v180_v13, %v179_v12  ;;  %v181_v15 = vld [vmem:[#allocation8 + $0x90] sm:$0xff]  ;;  %v182_v16 = vld [vmem:[#allocation8 + $0x98] sm:$0xff]  ;;  %v183_v21 = vld [vmem:[#allocation8 + $0xa0] sm:$0xff]  ;;  %s1552_s0 = smov [#allocation10]  }
  0x4e   :  { %1264 = vmatprep.subr.bf16.mxu0 %v1545_v0  ;;  %v93_v18 = vld [vmem:[#allocation8 + $0x30] sm:$0xff]  ;;  %v94_v19 = vld [vmem:[#allocation8 + $0x38] sm:$0xff]  ;;  %v1289_v20 = vpack.c.bf16 %v182_v16, %v181_v15  ;;  %v184_v22 = vld [vmem:[#allocation8 + $0xa8] sm:$0xff]  ;;  %s957_s21 = sshll.u32 %s1552_s0, 4  ;;  %s958_s21 = int_to_ptr.vmem [resolvable:$true] %s957_s21 }
  0x4f   :  { %1287 = vmatpush3.bf16.msra.mxu1 %v1286_v14  ;;  %v1271_v23 = vpack.c.bf16 %v94_v19, %v93_v18  ;;  %v95_v24 = vld [vmem:[#allocation8 + $0x40] sm:$0xff]  ;;  %v96_v25 = vld [vmem:[#allocation8 + $0x48] sm:$0xff]  ;;  %v1292_v26 = vpack.c.bf16 %v184_v22, %v183_v21  ;;  %v185_v27 = vld [vmem:[#allocation8 + $0xb0] sm:$0xff]  ;;  %s1509_s28 = scalar_lea.vmem %s958_s21, 128  ;;  %p1514_p5 = scmp.lt.s32.totalorder %s958_s21, %s958_s21 }
  0x50   :  { %78 = vrot.lane.b32.xlu0 %v72_v7, %s1549_s1  ;;  %1288 = vmatprep.subr.bf16.mxu1 %v1545_v0  ;;  %v186_v28 = vld [vmem:[#allocation8 + $0xb8] sm:$0xff]  ;;  %v1274_v29 = vpack.c.bf16 %v96_v25, %v95_v24  ;;  %v97_v30 = vld [vmem:[#allocation8 + $0x50] sm:$0xff]  ;;  %v187_v33 = vld [vmem:[#allocation8 + $0xc0] sm:$0xff]  ;;  %p1510_p4 = scmp.ne.s32.totalorder %s958_s21, %s1509_s28  ;;  %p1515_p6 = scmp.lt.s32.totalorder %s1509_s28, %s1509_s28 }
  0x51   :  { %1266 = vmatpush3.bf16.msra.mxu0 %v1265_v9  ;;  %v98_v31 = vld [vmem:[#allocation8 + $0x58] sm:$0xff]  ;;  %v1295_v32 = vpack.c.bf16 %v186_v28, %v185_v27  ;;  %v188_v34 = vld [vmem:[#allocation8 + $0xc8] sm:$0xff]  ;;  %v99_v36 = vld [vmem:[#allocation8 + $0x60] sm:$0xff] }
  0x52   :  { %1267 = vmatprep.subr.bf16.mxu0 %v1545_v0  ;;  %v1277_v35 = vpack.c.bf16 %v98_v31, %v97_v30  ;;  %v100_v37 = vld [vmem:[#allocation8 + $0x68] sm:$0xff]  ;;  %v1298_v38 = vpack.c.bf16 %v188_v34, %v187_v33  ;;  %v189_v39 = vld [vmem:[#allocation8 + $0xd0] sm:$0xff]  ;;  %v190_v40 = vld [vmem:[#allocation8 + $0xd8] sm:$0xff]  ;;  %p1516_p7 = por %p1515_p6, %p1514_p5 }
  0x53   :  { %1290 = vmatpush3.bf16.msra.mxu1 %v1289_v20  ;;  %v1280_v41 = vpack.c.bf16 %v100_v37, %v99_v36  ;;  %v101_v42 = vld [vmem:[#allocation8 + $0x70] sm:$0xff]  ;;  %v102_v43 = vld [vmem:[#allocation8 + $0x78] sm:$0xff]  ;;  %v1301_v44 = vpack.c.bf16 %v190_v40, %v189_v39  ;;  %v191_v45 = vld [vmem:[#allocation8 + $0xe0] sm:$0xff] }
  0x54   :  { %1291 = vmatprep.subr.bf16.mxu1 %v1545_v0  ;;  %v192_v46 = vld [vmem:[#allocation8 + $0xe8] sm:$0xff]  ;;  %v1283_v47 = vpack.c.bf16 %v102_v43, %v101_v42  ;;  %v193_v54 = vld [vmem:[#allocation8 + $0xf0] sm:$0xff]  ;;  %v194_v55 = vld [vmem:[#allocation8 + $0xf8] sm:$0xff]  ;;  %p1517_p8 = pnand %p1516_p7, %p1510_p4 }
  0x55   :  { %1269 = vmatpush3.bf16.msra.mxu0 %v1268_v17  ;;  %v1304_v48 = vpack.c.bf16 %v192_v46, %v191_v45  ;;  %v70_v50 = vld [vmem:[#allocation2] sm:$0xff]  ;;  %v1307_v56 = vpack.c.bf16 %v194_v55, %v193_v54  ;;  %v272_v57 = vld [vmem:[#allocation8 + $0x100] sm:$0xff]  ;;  %v274_v59 = vld [vmem:[#allocation8 + $0x110] sm:$0xff] }
  0x56   :  { %1270 = vmatprep.subr.bf16.mxu0 %v1545_v0  ;;  %v273_v58 = vld [vmem:[#allocation8 + $0x108] sm:$0xff]  ;;  %v275_v61 = vld [vmem:[#allocation8 + $0x118] sm:$0xff]  ;;  %v276_v63 = vld [vmem:[#allocation8 + $0x120] sm:$0xff] }
  0x57   :  { %1293 = vmatpush3.bf16.msra.mxu1 %v1292_v26  ;;  %v1310_v60 = vpack.c.bf16 %v273_v58, %v272_v57  ;;  %v1313_v62 = vpack.c.bf16 %v275_v61, %v274_v59  ;;  %v277_v2 = vld [vmem:[#allocation8 + $0x128] sm:$0xff]  ;;  %v278_v4 = vld [vmem:[#allocation8 + $0x130] sm:$0xff]  ;;  %v279_v5 = vld [vmem:[#allocation8 + $0x138] sm:$0xff] }
  0x58   :  { %1294 = vmatprep.subr.bf16.mxu1 %v1545_v0  ;;  %v1316_v3 = vpack.c.bf16 %v277_v2, %v276_v63  ;;  %v1319_v6 = vpack.c.bf16 %v279_v5, %v278_v4  ;;  %v280_v7 = vld [vmem:[#allocation8 + $0x140] sm:$0xff]  ;;  %v281_v8 = vld [vmem:[#allocation8 + $0x148] sm:$0xff]  ;;  %v282_v10 = vld [vmem:[#allocation8 + $0x150] sm:$0xff] }
  0x59   :  { %1272 = vmatpush3.bf16.msra.mxu0 %v1271_v23  ;;  %v1322_v9 = vpack.c.bf16 %v281_v8, %v280_v7  ;;  %v283_v11 = vld [vmem:[#allocation8 + $0x158] sm:$0xff]  ;;  %v284_v13 = vld [vmem:[#allocation8 + $0x160] sm:$0xff]  ;;  %v285_v14 = vld [vmem:[#allocation8 + $0x168] sm:$0xff] }
  0x5a   :  { %1273 = vmatprep.subr.bf16.mxu0 %v1545_v0  ;;  %v1325_v12 = vpack.c.bf16 %v283_v11, %v282_v10  ;;  %v1328_v15 = vpack.c.bf16 %v285_v14, %v284_v13  ;;  %v968_v16 = vld [vmem:[%s1781_s4] ss:$0 sm:$0xff]  ;;  %v286_v20 = vld [vmem:[#allocation8 + $0x170] sm:$0xff]  ;;  %v287_v21 = vld [vmem:[#allocation8 + $0x178] sm:$0xff] }
  0x5b   :  { %1296 = vmatpush3.bf16.msra.mxu1 %v1295_v32  ;;  %v1331_v22 = vpack.c.bf16 %v287_v21, %v286_v20  ;;  %v389_v23 = vld [vmem:[#allocation8 + $0x180] sm:$0xff]  ;;  %v390_v24 = vld [vmem:[#allocation8 + $0x188] sm:$0xff]  ;;  %v391_v26 = vld [vmem:[#allocation8 + $0x190] sm:$0xff] }
  0x5c   :  { %1297 = vmatprep.subr.bf16.mxu1 %v1545_v0  ;;  %v1334_v25 = vpack.c.bf16 %v390_v24, %v389_v23  ;;  %v392_v27 = vld [vmem:[#allocation8 + $0x198] sm:$0xff]  ;;  %v394_v30 = vld [vmem:[#allocation8 + $0x1a8] sm:$0xff]  ;;  %v395_v32 = vld [vmem:[#allocation8 + $0x1b0] sm:$0xff] }
  0x5d   :  { %1275 = vmatpush3.bf16.msra.mxu0 %v1274_v29  ;;  %v1337_v28 = vpack.c.bf16 %v392_v27, %v391_v26  ;;  %v393_v29 = vld [vmem:[#allocation8 + $0x1a0] sm:$0xff]  ;;  %v396_v33 = vld [vmem:[#allocation8 + $0x1b8] sm:$0xff]  ;;  %v398_v36 = vld [vmem:[#allocation8 + $0x1c8] sm:$0xff] }
  0x5e   :  { %1276 = vmatprep.subr.bf16.mxu0 %v1545_v0  ;;  %v1340_v31 = vpack.c.bf16 %v394_v30, %v393_v29  ;;  %v1343_v34 = vpack.c.bf16 %v396_v33, %v395_v32  ;;  %v400_v39 = vld [vmem:[#allocation8 + $0x1d8] sm:$0xff]  ;;  %v402_v42 = vld [vmem:[#allocation8 + $0x1e8] sm:$0xff]  ;;  %v482_v45 = vld [vmem:[#allocation8 + $0x200] sm:$0xff] }
  0x5f   :  { %1299 = vmatpush3.bf16.msra.mxu1 %v1298_v38  ;;  %v399_v38 = vld [vmem:[#allocation8 + $0x1d0] sm:$0xff]  ;;  %v483_v46 = vld [vmem:[#allocation8 + $0x208] sm:$0xff]  ;;  %v486_v55 = vld [vmem:[#allocation8 + $0x220] sm:$0xff] }
  0x60   :  { %1300 = vmatprep.subr.bf16.mxu1 %v1545_v0  ;;  %v1349_v40 = vpack.c.bf16 %v400_v39, %v399_v38  ;;  %v488_v58 = vld [vmem:[#allocation8 + $0x230] sm:$0xff]  ;;  %v489_v59 = vld [vmem:[#allocation8 + $0x238] sm:$0xff]  ;;  %v490_v61 = vld [vmem:[#allocation8 + $0x240] sm:$0xff] }
  0x61   :  { %1278 = vmatpush3.bf16.msra.mxu0 %v1277_v35  ;;  %v397_v35 = vld [vmem:[#allocation8 + $0x1c0] sm:$0xff]  ;;  %v492_v2 = vld [vmem:[#allocation8 + $0x250] sm:$0xff]  ;;  %v971_v14 = vld [vmem:[%s1781_s4 + $0x2] ss:$0 sm:$0xff] }
  0x62   :  { %1279 = vmatprep.subr.bf16.mxu0 %v1545_v0  ;;  %v1346_v37 = vpack.c.bf16 %v398_v36, %v397_v35  ;;  %v494_v5 = vld [vmem:[#allocation8 + $0x260] sm:$0xff]  ;;  %v403_v8 = vld [vmem:[#allocation8 + $0x1f0] sm:$0xff] }
  0x63   :  { %1302 = vmatpush3.bf16.msra.mxu1 %v1301_v44  ;;  %v970_v44 = vld [vmem:[%s1781_s4 + $0x1] ss:$0 sm:$0xff]  ;;  %v496_v11 = vld [vmem:[#allocation8 + $0x270] sm:$0xff] }
  0x64   :  { %1303 = vmatprep.subr.bf16.mxu1 %v1545_v0 }
  0x65   :  { %1281 = vmatpush3.bf16.msra.mxu0 %v1280_v41  ;;  %v401_v41 = vld [vmem:[#allocation8 + $0x1e0] sm:$0xff] }
  0x66   :  { %1282 = vmatprep.subr.bf16.mxu0 %v1545_v0  ;;  %v1352_v43 = vpack.c.bf16 %v402_v42, %v401_v41 }
  0x67   :  { %1305 = vmatpush3.bf16.msra.mxu1 %v1304_v48 }
  0x68   :  { %1306 = vmatprep.subr.bf16.mxu1 %v1545_v0 }
  0x69   :  { %1284 = vmatpush3.bf16.msra.mxu0 %v1283_v47 }
  0x6a   :  { %1309 = vmatprep.subr.bf16.mxu0 %v1545_v0 }
  0x6b   :  { %1308 = vmatpush3.bf16.msra.mxu1 %v1307_v56  ;;  %v487_v56 = vld [vmem:[#allocation8 + $0x228] sm:$0xff] }
  0x6c   :  { %1333 = vmatprep.subr.bf16.mxu1 %v1545_v0  ;;  %v1364_v57 = vpack.c.bf16 %v487_v56, %v486_v55 }
  0xbe   :  { %v75_v49 = vpop.permute.xlu0 %74 }
  0xbf   :  { %v82_v51 = vsel %vm81_vm1, %v70_v50, %v75_v49  ;;  %v1358_v50 = vpack.c.bf16 %v483_v46, %v482_v45 }
  0xc2   :  { %v79_v52 = vpop.permute.xlu0 %78 }
  0xc3   :  { %v84_v53 = vsel %vm83_vm2, %v82_v51, %v79_v52  ;;  %v484_v52 = vld [vmem:[#allocation8 + $0x210] sm:$0xff] }
  0xc4   :  { %1104 = vmatmul.mubr.msk.f32.vlgmr.msra.gmra.mrb[0].mxu0 %vm85_vm3, %v84_v53  ;;  %v485_v53 = vld [vmem:[#allocation8 + $0x218] sm:$0xff] }
  0xc5   :  { %1173 = vmatprep.mubr.msk.f32.mxu0 %vm1546_vm0, %v1547_v1  ;;  %1311 = vmatpush3.bf16.msra.mxu0 %v1310_v60  ;;  %v1361_v54 = vpack.c.bf16 %v485_v53, %v484_v52  ;;  %v1367_v60 = vpack.c.bf16 %v489_v59, %v488_v58 }
  0xc6   :  { %1312 = vmatprep.subr.bf16.mxu0 %v1545_v0 }
  0xc9   :  { %1314 = vmatpush3.bf16.msra.mxu0 %v1313_v62  ;;  %v491_v62 = vld [vmem:[#allocation8 + $0x248] sm:$0xff] }
  0xca   :  { %1315 = vmatprep.subr.bf16.mxu0 %v1545_v0  ;;  %v1370_v63 = vpack.c.bf16 %v491_v62, %v490_v61 }
  0xcd   :  { %1317 = vmatpush3.bf16.msra.mxu0 %v1316_v3  ;;  %v493_v3 = vld [vmem:[#allocation8 + $0x258] sm:$0xff] }
  0xce   :  { %1318 = vmatprep.subr.bf16.mxu0 %v1545_v0  ;;  %v1373_v4 = vpack.c.bf16 %v493_v3, %v492_v2 }
  0xd1   :  { %1320 = vmatpush3.bf16.msra.mxu0 %v1319_v6  ;;  %v495_v6 = vld [vmem:[#allocation8 + $0x268] sm:$0xff] }
  0xd2   :  { %1321 = vmatprep.subr.bf16.mxu0 %v1545_v0  ;;  %v1376_v7 = vpack.c.bf16 %v495_v6, %v494_v5 }
  0xd5   :  { %1323 = vmatpush3.bf16.msra.mxu0 %v1322_v9  ;;  %v404_v9 = vld [vmem:[#allocation8 + $0x1f8] sm:$0xff] }
  0xd6   :  { %1324 = vmatprep.subr.bf16.mxu0 %v1545_v0  ;;  %v1355_v10 = vpack.c.bf16 %v404_v9, %v403_v8 }
  0xd9   :  { %1326 = vmatpush3.bf16.msra.mxu0 %v1325_v12  ;;  %v497_v12 = vld [vmem:[#allocation8 + $0x278] sm:$0xff] }
  0xda   :  { %1327 = vmatprep.subr.bf16.mxu0 %v1545_v0  ;;  %v1379_v13 = vpack.c.bf16 %v497_v12, %v496_v11 }
  0xdd   :  { %1329 = vmatpush3.bf16.msra.mxu0 %v1328_v15 }
  0xde   :  { %1330 = vmatprep.subr.bf16.mxu0 %v1545_v0 }
  0xe1   :  { %1332 = vmatpush3.bf16.msra.mxu0 %v1331_v22 }
  0xe2   :  { %1357 = vmatprep.subr.bf16.mxu0 %v1545_v0 }
 0x197   :  { %v174_v17 = vpop.f32.mrb[0].mxu0 }
 0x198   :  { %v1673_v18 = vadd.f32 %v968_v16, %v174_v17  ;;  %v1105_v19 = vpop.f32.mrb[1].mxu0 }
 0x199   :  { %v972_v19 = vld [vmem:[%s1781_s4 + $0x3] ss:$0 sm:$0xff] }
 0x19a   :  { %1139 = vmatmul.mubr.f32.vlgmr.msra.gmra.mrb[0].mxu1 %v1673_v18  ;;  %v573_v26 = vmul.f32 %v1673_v18, %v1673_v18 }
 0x19b   :  { %1208 = vmatprep.mubr.msk.f32.mxu1 %vm1546_vm0, %v1547_v1  ;;  %1335 = vmatpush3.bf16.msra.mxu1 %v1334_v25 }
 0x19c   :  { %1336 = vmatprep.subr.bf16.mxu1 %v1545_v0  ;;  %v574_v36 = vsel %vm81_vm1, %v573_v26, 0.0 }
 0x19f   :  { %1338 = vmatpush3.bf16.msra.mxu1 %v1337_v28 }
 0x1a0   :  { %1339 = vmatprep.subr.bf16.mxu1 %v1545_v0 }
 0x1a3   :  { %1341 = vmatpush3.bf16.msra.mxu1 %v1340_v31 }
 0x1a4   :  { %1342 = vmatprep.subr.bf16.mxu1 %v1545_v0 }
 0x1a7   :  { %1344 = vmatpush3.bf16.msra.mxu1 %v1343_v34 }
 0x1a8   :  { %1345 = vmatprep.subr.bf16.mxu1 %v1545_v0 }
 0x1ab   :  { %1347 = vmatpush3.bf16.msra.mxu1 %v1346_v37 }
 0x1ac   :  { %1348 = vmatprep.subr.bf16.mxu1 %v1545_v0 }
 0x1af   :  { %1350 = vmatpush3.bf16.msra.mxu1 %v1349_v40 }
 0x1b0   :  { %1351 = vmatprep.subr.bf16.mxu1 %v1545_v0 }
 0x1b3   :  { %1353 = vmatpush3.bf16.msra.mxu1 %v1352_v43 }
 0x1b4   :  { %1354 = vmatprep.subr.bf16.mxu1 %v1545_v0 }
 0x1b7   :  { %1356 = vmatpush3.bf16.msra.mxu1 %v1355_v10 }
 0x1b8   :  { %1246 = vmatprep.subr.mxu1 %v1547_v1 }
 0x26d   :  { %v266_v47 = vpop.f32.mrb[0].mxu1 }
 0x26e   :  { %v267_v48 = vadd.f32 %v970_v44, %v266_v47  ;;  %v1140_v49 = vpop.f32.mrb[1].mxu1 }
 0x270   :  { %v270_v51 = vmax.f32 %v267_v48, 0.0 }
 0x272   :  { %1174 = vmatmul.mubr.f32.vlgmr.msra.gmra.mrb[2].mxu0 %v270_v51 }
 0x273   :  { %1359 = vmatpush3.bf16.msra.mxu0 %v1358_v50  ;;  %1243 = vmatprep.mubr.msk.f32.mxu0 %vm1546_vm0, %v1547_v1 }
 0x274   :  { %1360 = vmatprep.subr.bf16.mxu0 %v1545_v0 }
 0x277   :  { %1362 = vmatpush3.bf16.msra.mxu0 %v1361_v54 }
 0x278   :  { %1363 = vmatprep.subr.bf16.mxu0 %v1545_v0 }
 0x27b   :  { %1365 = vmatpush3.bf16.msra.mxu0 %v1364_v57 }
 0x27c   :  { %1366 = vmatprep.subr.bf16.mxu0 %v1545_v0 }
 0x27f   :  { %1368 = vmatpush3.bf16.msra.mxu0 %v1367_v60 }
 0x280   :  { %1369 = vmatprep.subr.bf16.mxu0 %v1545_v0 }
 0x283   :  { %1371 = vmatpush3.bf16.msra.mxu0 %v1370_v63 }
 0x284   :  { %1372 = vmatprep.subr.bf16.mxu0 %v1545_v0 }
 0x287   :  { %1374 = vmatpush3.bf16.msra.mxu0 %v1373_v4 }
 0x288   :  { %1375 = vmatprep.subr.bf16.mxu0 %v1545_v0 }
 0x28b   :  { %1377 = vmatpush3.bf16.msra.mxu0 %v1376_v7 }
 0x28c   :  { %1378 = vmatprep.subr.bf16.mxu0 %v1545_v0 }
 0x28f   :  { %1380 = vmatpush3.bf16.msra.mxu0 %v1379_v13 }
 0x345   :  { %v359_v15 = vpop.f32.mrb[2].mxu0 }
 0x346   :  { %v1702_v16 = vadd.f32 %v971_v14, %v359_v15  ;;  %v1175_v17 = vpop.f32.mrb[3].mxu0 }
 0x348   :  { %1209 = vmatmul.mubr.f32.vlgmr.msra.gmra.mrb[2].mxu1 %v1702_v16  ;;  %v480_v0 = vmax.f32 %v1702_v16, 0.0  ;;  %v370_v40 = vsub.f32 0.0, %v1702_v16 }
 0x349   :  { %1248 = vmatprep.mubr.msk.f32.mxu1 %vm1546_vm0, %v1547_v1 }
 0x34a   :  { %1244 = vmatmul.mubr.f32.vlgmr.msra.gmra.mrb[4].mxu0 %v480_v0  ;;  %v371_v44 = vmul.f32 1.442695, %v370_v40 }
 0x41b   :  { %v476_v20 = vpop.f32.mrb[2].mxu1 }
 0x41c   :  { %v477_v21 = vadd.f32 %v972_v19, %v476_v20  ;;  %v1210_v22 = vpop.f32.mrb[3].mxu1 }
 0x41d   :  { %v1711_v23 = vpop.f32.mrb[4].mxu0 }
 0x41e   :  { %v1245_v24 = vpop.f32.mrb[5].mxu0  ;;  %v579_v25 = vmul.f32 %v477_v21, %v477_v21 }
 0x420   :  { %822 = vrot.lane.b32.xlu0 %v579_v25, %s1550_s24  ;;  %697 = vrot.lane.b32.xlu1 %v579_v25, %s1551_s25  ;;  %v580_v35 = vsel %vm81_vm1, %v579_v25, 0.0 }
 0x424   :  { %687 = vrot.lane.b32.xlu1 %v573_v26, %s1551_s25 }
 0x428   :  { %814 = vrot.lane.b32.xlu1 %v573_v26, %s1550_s24 }
 0x492   :  { %v698_v27 = vpop.permute.xlu1 %697  ;;  %v823_v29 = vpop.permute.xlu0 %822 }
 0x493   :  { %v700_v28 = vsel %vm690_vm4, %v698_v27, 0.0  ;;  %v825_v31 = vsel %vm690_vm4, %v823_v29, 0.0 }
 0x494   :  { %701 = vadd.xlane.f32.xlu0 %v700_v28 }
 0x496   :  { %v688_v30 = vpop.permute.xlu1 %687 }
 0x497   :  { %v691_v32 = vsel %vm690_vm4, %v688_v30, 0.0 }
 0x498   :  { %826 = vadd.xlane.f32.xlu0 %v825_v31  ;;  %692 = vadd.xlane.f32.xlu1 %v691_v32 }
 0x49a   :  { %v815_v33 = vpop.permute.xlu1 %814 }
 0x49b   :  { %v817_v34 = vsel %vm690_vm4, %v815_v33, 0.0 }
 0x49c   :  { %818 = vadd.xlane.f32.xlu0 %v817_v34  ;;  %581 = vadd.xlane.f32.xlu1 %v580_v35 }
 0x4a0   :  { %575 = vadd.xlane.f32.xlu0 %v574_v36 }
 0x521   :  { %v702_v37 = vpop.xlane.xlu0 %701 }
 0x522   :  { %1395 = vrsqrt.f32 %v702_v37 }
 0x525   :  { %v827_v38 = vpop.xlane.xlu0 %826  ;;  %v693_v39 = vpop.xlane.xlu1 %692 }
 0x526   :  { %1397 = vrsqrt.f32 %v827_v38 }
 0x527   :  { %1399 = vrsqrt.f32 %v693_v39 }
 0x529   :  { %v819_v41 = vpop.xlane.xlu0 %818  ;;  %v582_v42 = vpop.xlane.xlu1 %581 }
 0x52a   :  { %1401 = vrsqrt.f32 %v819_v41 }
 0x52b   :  { %1403 = vrsqrt.f32 %v582_v42 }
 0x52c   :  { %v1396_v43 = vpop.eup %1395 }
 0x52d   :  { %v576_v45 = vpop.xlane.xlu0 %575  ;;  %v704_v46 = vmul.f32 %v1396_v43, %v477_v21 }
 0x52e   :  { %1405 = vrsqrt.f32 %v576_v45 }
 0x52f   :  { %717 = vrot.lane.b32.xlu1 %v704_v46, %s1551_s25  ;;  %1407 = vpow2.f32 %v371_v44 }
 0x530   :  { %v1398_v47 = vpop.eup %1397 }
 0x531   :  { %v1400_v48 = vpop.eup %1399  ;;  %v829_v49 = vmul.f32 %v1398_v47, %v477_v21 }
 0x532   :  { %v695_v50 = vmul.f32 %v1400_v48, %v1673_v18 }
 0x533   :  { %842 = vrot.lane.b32.xlu1 %v829_v49, %s1550_s24 }
 0x534   :  { %v1402_v51 = vpop.eup %1401  ;;  %714 = vrot.lane.b32.xlu0 %v695_v50, %s1551_s25  ;;  %v705_v52 = vmul.f32 %v704_v46, %v695_v50 }
 0x535   :  { %v1404_v53 = vpop.eup %1403  ;;  %v821_v54 = vmul.f32 %v1402_v51, %v1673_v18 }
 0x536   :  { %v584_v55 = vmul.f32 %v1404_v53, %v477_v21 }
 0x537   :  { %839 = vrot.lane.b32.xlu1 %v821_v54, %s1550_s24  ;;  %v830_v56 = vmul.f32 %v829_v49, %v821_v54 }
 0x538   :  { %v1406_v57 = vpop.eup %1405  ;;  %364 = vrot.lane.b32.xlu0 %v1673_v18, %s1550_s24  ;;  %1247 = vmatpush3.xpose.msk.msra.mxu1 %vm81_vm1, %v584_v55 }
 0x539   :  { %v578_v58 = vmul.f32 %v1406_v57, %v1673_v18  ;;  %1251 = vmatprep.subr.mxu1 %v1547_v1  ;;  %v1408_v59 = vpop.eup %1407 }
 0x53b   :  { %1249 = vmatmul.mubr.msk.f32.vlgmr.msra.gmra.mrb[4].mxu1 %vm81_vm1, %v578_v58  ;;  %374 = vrot.lane.b32.xlu1 %v1408_v59, %s1550_s24  ;;  %v585_v60 = vmul.f32 %v584_v55, %v578_v58 }
 0x53c   :  { %1253 = vmatprep.mubr.msk.f32.mxu1 %vm1546_vm0, %v1547_v1 }
 0x5a1   :  { %v718_v61 = vpop.permute.xlu1 %717 }
 0x5a2   :  { %1252 = vmatpush3.xpose.msk.msra.mxu1 %vm690_vm4, %v718_v61 }
 0x5a3   :  { %1256 = vmatprep.subr.mxu1 %v1547_v1 }
 0x5a5   :  { %v843_v62 = vpop.permute.xlu1 %842 }
 0x5a6   :  { %v715_v63 = vpop.permute.xlu0 %714 }
 0x5a7   :  { %1254 = vmatmul.mubr.msk.f32.vlgmr.msra.gmra.mrb[6].mxu1 %vm690_vm4, %v715_v63 }
 0x5a8   :  { %1257 = vmatpush3.xpose.msk.msra.mxu1 %vm690_vm4, %v843_v62  ;;  %1258 = vmatprep.mubr.msk.f32.mxu1 %vm1546_vm0, %v1547_v1  ;;  %v586_v1 = vsel %vm81_vm1, %v585_v60, 0.0 }
 0x5a9   :  { %v840_v18 = vpop.permute.xlu1 %839 }
 0x5aa   :  { %v365_v2 = vpop.permute.xlu0 %364 }
 0x5ab   :  { %v367_v3 = vsub.f32 %v1702_v16, %v365_v2  ;;  %1259 = vmatmul.mubr.msk.f32.vlgmr.msra.gmra.mrb[8].mxu1 %vm690_vm4, %v840_v18 }
 0x5ad   :  { %v368_v4 = vmul.f32 %v367_v3, %v367_v3  ;;  %v375_v6 = vpop.permute.xlu1 %374 }
 0x5af   :  { %v369_v5 = vmul.f32 -0.5, %v368_v4 }
 0x5b1   :  { %v377_v7 = vmul.f32 %v375_v6, %v369_v5 }
 0x5b3   :  { %v378_v8 = vsel %vm81_vm1, %v377_v7, 0.0 }
 0x5b4   :  { %379 = vadd.xlane.f32.xlu0 %v378_v8  ;;  %v939_v8 = vlaneseq }
 0x60e   :  { %v661_v9 = vpop.f32.mrb[4].mxu1 }
 0x60f   :  { %v1250_v10 = vpop.f32.mrb[5].mxu1  ;;  %v666_v11 = vsel %vm665_vm5, %v661_v9, -inf }
 0x610   :  { %667 = vmax.xlane.f32.xlu1 %v666_v11 }
 0x614   :  { %587 = vadd.xlane.f32.xlu1 %v586_v1 }
 0x625   :  { %707 = vrot.lane.b32.xlu1 %v705_v52, %s1551_s25 }
 0x641   :  { %v380_v27 = vpop.xlane.xlu0 %379 }
 0x642   :  { %v381_v54 = vrot.slane %v380_v27, 4 }
 0x644   :  { %v382_v58 = vadd.f32 %v381_v54, %v380_v27 }
 0x646   :  { %v383_v62 = vrot.slane %v382_v58, 2 }
 0x648   :  { %v384_v5 = vadd.f32 %v383_v62, %v382_v58 }
 0x64a   :  { %v385_v11 = vrot.slane %v384_v5, 1 }
 0x67a   :  { %v789_v12 = vpop.f32.mrb[6].mxu1 }
 0x67b   :  { %v1255_v13 = vpop.f32.mrb[7].mxu1  ;;  %v793_v14 = vsel %vm665_vm5, %v789_v12, -inf }
 0x67c   :  { %794 = vmax.xlane.f32.xlu0 %v793_v14  ;;  %v940_v13 = vshrl.u32 %v939_v8, 7  ;;  %v942_v14 = vand.u32 127, %v939_v8 }
 0x67e   :  { %v914_v15 = vpop.f32.mrb[8].mxu1  ;;  %vm943_vm6 = vcmp.eq.s32.totalorder %v940_v13, 0  ;;  %vm944_vm7 = vcmp.eq.s32.totalorder %v942_v14, 126  ;;  %vm947_vm8 = vcmp.eq.s32.totalorder %v942_v14, 127 }
 0x67f   :  { %v1260_v16 = vpop.f32.mrb[9].mxu1  ;;  %v918_v17 = vsel %vm665_vm5, %v914_v15, -inf  ;;  %vm945_vm9 = vmand %vm943_vm6, %vm944_vm7 }
 0x680   :  { %919 = vmax.xlane.f32.xlu0 %v918_v17  ;;  %v386_v17 = vadd.f32 %v385_v11, %v384_v5  ;;  %vm948_vm10 = vmand %vm943_vm6, %vm947_vm8 }
 0x69d   :  { %v668_v0 = vpop.xlane.xlu1 %667 }
 0x69e   :  { %v669_v19 = vsub.f32 %v661_v9, %v668_v0 }
 0x6a0   :  { %v670_v20 = vmul.f32 1.442695, %v669_v19 }
 0x6a1   :  { %v588_v21 = vpop.xlane.xlu1 %587 }
 0x6a2   :  { %1409 = vpow2.f32 %v670_v20  ;;  %v973_v20 = vld [vmem:[%s1781_s4 + $0x4] ss:$0 sm:$0xff] }
 0x6a3   :  { %v570_v27 = vadd.f32 %v973_v20, %v1711_v23 }
 0x6a5   :  { %v708_v25 = vpop.permute.xlu1 %707 }
 0x6a6   :  { %v710_v26 = vsel %vm690_vm4, %v708_v25, 0.0 }
 0x6ac   :  { %v1410_v22 = vpop.eup %1409 }
 0x6ad   :  { %v672_v24 = vsel %vm665_vm5, %v1410_v22, 0.0 }
 0x6ae   :  { %673 = vadd.xlane.f32.xlu0 %v672_v24  ;;  %v387_v24 = vmul.f32 0.125, %v386_v17 }
 0x6b2   :  { %711 = vadd.xlane.f32.xlu0 %v710_v26 }
 0x6c8   :  { %832 = vrot.lane.b32.xlu0 %v830_v56, %s1550_s24 }
 0x709   :  { %v795_v28 = vpop.xlane.xlu0 %794 }
 0x70a   :  { %v796_v29 = vsub.f32 %v789_v12, %v795_v28 }
 0x70c   :  { %v797_v30 = vmul.f32 1.442695, %v796_v29  ;;  %v946_v29 = vsel %vm945_vm9, %v387_v24, %v570_v27 }
 0x70d   :  { %v920_v31 = vpop.xlane.xlu0 %919 }
 0x70e   :  { %1411 = vpow2.f32 %v797_v30  ;;  %v921_v32 = vsub.f32 %v914_v15, %v920_v31 }
 0x710   :  { %v922_v33 = vmul.f32 1.442695, %v921_v32 }
 0x712   :  { %1413 = vpow2.f32 %v922_v33 }
 0x718   :  { %v1412_v34 = vpop.eup %1411 }
 0x719   :  { %v799_v35 = vsel %vm665_vm5, %v1412_v34, 0.0 }
 0x71a   :  { %800 = vadd.xlane.f32.xlu1 %v799_v35 }
 0x71c   :  { %v1414_v36 = vpop.eup %1413 }
 0x71d   :  { %v924_v37 = vsel %vm665_vm5, %v1414_v36, 0.0 }
 0x71e   :  { %925 = vadd.xlane.f32.xlu1 %v924_v37 }
 0x73b   :  { %v674_v38 = vpop.xlane.xlu0 %673 }
 0x73f   :  { %v712_v39 = vpop.xlane.xlu0 %711 }
 0x743   :  { %v833_v40 = vpop.permute.xlu0 %832 }
 0x744   :  { %v835_v41 = vsel %vm690_vm4, %v833_v40, 0.0 }
 0x745   :  { %836 = vadd.xlane.f32.xlu0 %v835_v41 }
 0x7a7   :  { %v801_v42 = vpop.xlane.xlu1 %800 }
 0x7a8   :  { %1415 = vlog2.f32 %v801_v42 }
 0x7a9   :  { %1417 = vlog2.f32 %v674_v38 }
 0x7ab   :  { %v926_v48 = vpop.xlane.xlu1 %925 }
 0x7ac   :  { %1419 = vlog2.f32 %v926_v48 }
 0x7b2   :  { %v1416_v43 = vpop.eup %1415 }
 0x7b3   :  { %v1418_v44 = vpop.eup %1417  ;;  %v803_v45 = vmul.f32 0.6931472, %v1416_v43 }
 0x7b4   :  { %v676_v46 = vmul.f32 0.6931472, %v1418_v44 }
 0x7b5   :  { %v804_v47 = vadd.f32 %v803_v45, %v795_v28 }
 0x7b6   :  { %v677_v49 = vadd.f32 %v676_v46, %v668_v0  ;;  %v1420_v56 = vpop.eup %1419 }
 0x7b7   :  { %v805_v50 = vsub.f32 %v804_v47, %v712_v39  ;;  %v928_v60 = vmul.f32 0.6931472, %v1420_v56 }
 0x7b8   :  { %v678_v51 = vsub.f32 %v677_v49, %v588_v21 }
 0x7b9   :  { %v806_v52 = vrot.slane %v805_v50, 4  ;;  %v929_v18 = vadd.f32 %v928_v60, %v920_v31 }
 0x7ba   :  { %v679_v53 = vrot.slane %v678_v51, 4 }
 0x7bb   :  { %v807_v55 = vadd.f32 %v806_v52, %v805_v50 }
 0x7bc   :  { %v680_v57 = vadd.f32 %v679_v53, %v678_v51 }
 0x7bd   :  { %v808_v59 = vrot.slane %v807_v55, 2 }
 0x7be   :  { %v681_v61 = vrot.slane %v680_v57, 2 }
 0x7bf   :  { %v809_v63 = vadd.f32 %v808_v59, %v807_v55 }
 0x7c0   :  { %v682_v3 = vadd.f32 %v681_v61, %v680_v57 }
 0x7c1   :  { %v810_v6 = vrot.slane %v809_v63, 1 }
 0x7c2   :  { %v683_v9 = vrot.slane %v682_v3, 1 }
 0x7c3   :  { %v811_v12 = vadd.f32 %v810_v6, %v809_v63 }
 0x7c4   :  { %v684_v16 = vadd.f32 %v683_v9, %v682_v3 }
 0x7c5   :  { %v812_v19 = vmul.f32 0.125, %v811_v12 }
 0x7c6   :  { %v685_v22 = vmul.f32 0.125, %v684_v16 }
 0x7c8   :  { %v813_v26 = vadd.f32 %v812_v19, %v685_v22 }
 0x7d2   :  { %v837_v2 = vpop.xlane.xlu0 %836 }
 0x7d3   :  { %v930_v4 = vsub.f32 %v929_v18, %v837_v2 }
 0x7d5   :  { %v931_v7 = vrot.slane %v930_v4, 4 }
 0x7d7   :  { %v932_v10 = vadd.f32 %v931_v7, %v930_v4 }
 0x7d9   :  { %v933_v1 = vrot.slane %v932_v10, 2 }
 0x7db   :  { %v934_v15 = vadd.f32 %v933_v1, %v932_v10 }
 0x7dd   :  { %v935_v0 = vrot.slane %v934_v15, 1 }
 0x7df   :  { %v936_v21 = vadd.f32 %v935_v0, %v934_v15 }
 0x7e1   :  { %v937_v25 = vmul.f32 0.125, %v936_v21 }
 0x7e3   :  { %v938_v28 = vadd.f32 %v937_v25, %v813_v26 }
 0x7e5   :  { %v949_v30 = vsel %vm948_vm10, %v938_v28, %v946_v29 }
 0x7e6   :  { %950 = vst [vmem:[#allocation10] sm:$0xff] %v949_v30 }
 0x7e7   :  { %1520 = shalt.err (!%p1517_p8)
}
 0x7e8   :  { %s1521_s30 = scalar_lea.hbm %s1782_s5, 128 }
 0x7e9   :  { %p1522_p9 = scmp.ne.s32.totalorder %s1782_s5, %s1521_s30  ;;  %p1525_p10 = scmp.lt.u32.totalorder %s1521_s30, %s1782_s5 }
 0x7eb   :  { %p1527_p11 = pnand %p1525_p10, %p1522_p9 }
 0x7ed   :  { %1530 = shalt.err (!%p1527_p11)
}
 0x7ee   :  { %960 = dma.vmem_to_hbm [thread:$0]  %s958_s21, 128, %s1782_s5, [#allocation4]  }
 0x7ef   :  { %1537 = dma.done.wait [#allocation4], 128  }
 0x7f0   :  { %1538 = vsyncadd [#allocation4], 4294967168 }
 0x7f1   :  { %964 = vsyncpa [#allocation3], 1 }
 0x7f2   :  { %965 = vsyncpa [#allocation6], 1 }
 0x7f3   :  { %966 = vsyncpa [#allocation9], 1 }
 0x7f4   :  { %967 = vsyncpa [#allocation4], 1 }

</bundles_post_ra>
